<compile_context>
chip_gen: v5e
topology: v5e:2x2
jax: 0.10.0
libtpu: 0.0.40
codegen_flags: <defaults>
</compile_context>

<pallas_src>
import jax
import jax.numpy as jnp
from jax.experimental import pallas as pl
from jax.experimental.pallas import tpu as pltpu

_LANE = 128      # vreg lane width
_SUB = 8         # f32 sublane count (output blocks are (8, 128))
_MAX_TM = 2048   # max sublane rows per grid step (2048*128*4B = 1 MiB per f32 input block)


def _round_up(x, m):
    return ((x + m - 1) // m) * m


def _pos_loss_partial_kernel(f1_ref, f2_ref, psum_ref):
    # f1_ref, f2_ref : VMEM (tm, 128) tiles of the flattened gathered features
    # psum_ref       : VMEM (8, 128)  per-tile per-(sublane, lane) partial sums
    d = f1_ref[...].astype(jnp.float32) - f2_ref[...].astype(jnp.float32)
    d2 = d * d
    tm = d2.shape[0]
    # (tm,128) -> (tm//8, 8, 128) groups whole vregs; sum(axis=0) is pure VPU adds.
    psum_ref[...] = jnp.sum(d2.reshape(tm // _SUB, _SUB, _LANE), axis=0)


def positive_loss(out_1, out_2, match_1, match_2, nonmatch_2=None, margin=0.5):
    """Pallas implementation of PositiveLoss.forward (nonmatch_2/margin unused,
    exactly like the reference forward)."""
    B, C, W, H = out_1.shape
    N = match_1.shape[1]

    # Sparse gather of only the matched feature vectors, straight from NCHW.
    bidx = jnp.arange(B)[:, None]
    f1 = out_1[bidx, :, match_1[:, :, 0], match_1[:, :, 1]]  # (B, N, C)
    f2 = out_2[bidx, :, match_2[:, :, 0], match_2[:, :, 1]]  # (B, N, C)

    # Keep sub-32-bit inputs narrow into the kernel (halves HBM bytes);
    # bf16 packs 16 rows per vreg so tm must be a multiple of 16 then.
    sub_mult = 16 if jnp.dtype(f1.dtype).itemsize < 4 else _SUB

    total = B * N * C
    rows = _round_up(pl.cdiv(total, _LANE), sub_mult)

    # Balanced tiling: as few, as-large-as-possible tiles; padding bounded by
    # < sub_mult rows per tile.  Keep >= 2 parallel steps (v7x has 2 TCs) when
    # there are enough rows to split.
    g = pl.cdiv(rows, _MAX_TM)
    if rows >= 2 * sub_mult:
        g = max(g, 2)
    tm = _round_up(pl.cdiv(rows, g), sub_mult)
    g = pl.cdiv(rows, tm)

    padded_rows = g * tm
    padded_total = padded_rows * _LANE
    pad = padded_total - total

    flat1 = f1.reshape(-1)
    flat2 = f2.reshape(-1)
    if pad:
        # Zero padding contributes 0 to the sum; mean divides by B*N, not the
        # padded count.  allow_input_fusion lets XLA fuse this into the
        # pallas_call input instead of a separate HBM round-trip.
        flat1 = jnp.pad(flat1, (0, pad))
        flat2 = jnp.pad(flat2, (0, pad))
    a1 = flat1.reshape(padded_rows, _LANE)
    a2 = flat2.reshape(padded_rows, _LANE)

    psums = pl.pallas_call(
        _pos_loss_partial_kernel,
        out_shape=jax.ShapeDtypeStruct((g * _SUB, _LANE), jnp.float32),
        grid=(g,),
        in_specs=[
            pl.BlockSpec((tm, _LANE), lambda i: (i, 0)),
            pl.BlockSpec((tm, _LANE), lambda i: (i, 0)),
        ],
        out_specs=pl.BlockSpec((_SUB, _LANE), lambda i: (i, 0)),
        compiler_params=pltpu.CompilerParams(
            dimension_semantics=("parallel",),      # independent tiles -> megacore-friendly
            allow_input_fusion=[True, True],        # fuse pad/reshape producers into inputs
        ),
    )(a1, a2)

    # Tiny final reduction + mean over (b, n) in the wrapper.
    return jnp.sum(psums) / jnp.float32(B * N)


def positive_loss_ref(out_1, out_2, match_1, match_2):
    """Pure-JAX reference mirroring the PyTorch code (accumulation in f32)."""
    b = out_1.shape[0]
    bidx = jnp.arange(b)[:, None]
    f1 = out_1[bidx, :, match_1[:, :, 0], match_1[:, :, 1]].astype(jnp.float32)
    f2 = out_2[bidx, :, match_2[:, :, 0], match_2[:, :, 1]].astype(jnp.float32)
    return jnp.mean(jnp.sum((f1 - f2) ** 2, axis=-1))


def _make_inputs(key, B, C, W, H, N, dtype=jnp.float32):
    k1, k2, k3x, k3y, k4x, k4y, k5x, k5y = jax.random.split(key, 8)
    out_1 = jax.random.normal(k1, (B, C, W, H), dtype=jnp.float32).astype(dtype)
    out_2 = jax.random.normal(k2, (B, C, W, H), dtype=jnp.float32).astype(dtype)
    match_1 = jnp.stack(
        [jax.random.randint(k3x, (B, N), 0, W, dtype=jnp.int32),
         jax.random.randint(k3y, (B, N), 0, H, dtype=jnp.int32)], axis=-1)
    match_2 = jnp.stack(
        [jax.random.randint(k4x, (B, N), 0, W, dtype=jnp.int32),
         jax.random.randint(k4y, (B, N), 0, H, dtype=jnp.int32)], axis=-1)
    nonmatch_2 = jnp.stack(
        [jax.random.randint(k5x, (B, N), 0, W, dtype=jnp.int32),
         jax.random.randint(k5y, (B, N), 0, H, dtype=jnp.int32)], axis=-1)  # unused by forward
    return out_1, out_2, match_1, match_2, nonmatch_2


if __name__ == "__main__":
    key = jax.random.PRNGKey(0)
    k_a, k_b, k_c = jax.random.split(key, 3)

    # Case 1: small, non-square spatial, f32 (single-tile path).
    o1, o2, m1, m2, nm2 = _make_inputs(k_a, B=2, C=4, W=16, H=12, N=8)
    loss = jax.block_until_ready(positive_loss(o1, o2, m1, m2, nm2))
    ref = positive_loss_ref(o1, o2, m1, m2)
    assert jnp.allclose(loss, ref, rtol=1e-5, atol=1e-6), (loss, ref)

    # Case 2: larger, exercises balanced multi-tile path (g >= 2) + tail padding.
    o1, o2, m1, m2, nm2 = _make_inputs(k_b, B=2, C=32, W=32, H=24, N=300)
    loss = jax.block_until_ready(positive_loss(o1, o2, m1, m2, nm2))
    ref = positive_loss_ref(o1, o2, m1, m2)
    assert jnp.allclose(loss, ref, rtol=1e-5, atol=1e-5), (loss, ref)

    # Case 3: bf16 inputs stay bf16 into the kernel (16-sublane tiles, in-vreg upcast).
    o1, o2, m1, m2, nm2 = _make_inputs(k_c, B=2, C=8, W=16, H=12, N=16, dtype=jnp.bfloat16)
    loss = jax.block_until_ready(positive_loss(o1, o2, m1, m2, nm2))
    ref = positive_loss_ref(o1, o2, m1, m2)
    assert jnp.allclose(loss, ref, rtol=1e-5, atol=1e-5), (loss, ref)

    print("KERNEL_OK")
</pallas_src>

<mosaic_0001>
module attributes {stable_mosaic.version = 11 : i64} {
  func.func @_pos_loss_partial_kernel(%arg0: i32, %arg1: memref<8x128xf32, #tpu.memory_space<vmem>>, %arg2: memref<8x128xf32, #tpu.memory_space<vmem>>, %arg3: memref<8x128xf32, #tpu.memory_space<vmem>>) attributes {dimension_semantics = [#tpu.dimension_semantics<parallel>], iteration_bounds = array<i64: 1>, scalar_prefetch = 0 : i64, scratch_operands = 0 : i64, tpu.core_type = #tpu.core_type<tc>, window_params = [{transform_indices = @transform_0, window_bounds = array<i64: 8, 128>}, {transform_indices = @transform_1, window_bounds = array<i64: 8, 128>}, {transform_indices = @transform_2, window_bounds = array<i64: 8, 128>}]} {
    %c0 = arith.constant 0 : index
    %c0_0 = arith.constant 0 : index
    %0 = vector.load %arg1[%c0, %c0_0] : memref<8x128xf32, #tpu.memory_space<vmem>>, vector<8x128xf32>
    %c0_1 = arith.constant 0 : index
    %c0_2 = arith.constant 0 : index
    %1 = vector.load %arg2[%c0_1, %c0_2] : memref<8x128xf32, #tpu.memory_space<vmem>>, vector<8x128xf32>
    %2 = arith.subf %0, %1 : vector<8x128xf32>
    %3 = arith.mulf %2, %2 : vector<8x128xf32>
    %4 = vector.shape_cast %3 : vector<8x128xf32> to vector<1x8x128xf32>
    %cst = arith.constant dense<0.000000e+00> : vector<8x128xf32>
    %5 = vector.multi_reduction <add>, %4, %cst [0] : vector<1x8x128xf32> to vector<8x128xf32>
    %c0_3 = arith.constant 0 : index
    %c0_4 = arith.constant 0 : index
    %6 = vector.load %arg3[%c0_3, %c0_4] : memref<8x128xf32, #tpu.memory_space<vmem>>, vector<8x128xf32>
    tpu.vector_store %arg3[%c0_3, %c0_4], %5 {strides = array<i32>} : memref<8x128xf32, #tpu.memory_space<vmem>>, vector<8x128xf32>,
    return
  }
  func.func @transform_0(%arg0: i32) -> (i32, i32) {
    %c0_i32 = arith.constant 0 : i32
    %c0_i32_0 = arith.constant 0 : i32
    return %arg0, %c0_i32 : i32, i32
  }
  func.func @transform_1(%arg0: i32) -> (i32, i32) {
    %c0_i32 = arith.constant 0 : i32
    %c0_i32_0 = arith.constant 0 : i32
    return %arg0, %c0_i32 : i32, i32
  }
  func.func @transform_2(%arg0: i32) -> (i32, i32) {
    %c0_i32 = arith.constant 0 : i32
    %c0_i32_0 = arith.constant 0 : i32
    return %arg0, %c0_i32 : i32, i32
  }
}

</mosaic_0001>

<bundles_post_ra>
// kernel: tpu_custom_call.1
= control target key start
LH: loop header
LB: loop body
LE: loop exit
PB: predicated region body
PF: predicated region fallthrough
CT: control target
= control target key end

     0   :  { %7 = vsyncpa [#allocation3], 0  ;;  %s172_s0 = inlined_call_operand.hbm [shape: f32[8,128], index: 0, kind: input, shape index: {}]   ;;  %s173_s1 = inlined_call_operand.hbm [shape: f32[8,128], index: 1, kind: input, shape index: {}]   ;;  %s174_s2 = inlined_call_operand.hbm [shape: f32[8,128], index: 2, kind: output, shape index: {}]  }
   0x1   :  { %8 = vsyncpa [#allocation6], 0 }
   0x2   :  { %9 = vsyncpa [#allocation4], 0  ;;  %s15_s11 = sshll.u32 %s172_s0, 4  ;;  %s145_s12 = smov [#allocation2]   ;;  %s16_s11 = int_to_ptr.hbm [resolvable:$true] %s15_s11 }
   0x3   :  { %s17_s13 = sshll.u32 %s145_s12, 4  ;;  %s26_s16 = sshll.u32 %s173_s1, 4  ;;  %s18_s13 = int_to_ptr.vmem [resolvable:$true] %s17_s13  ;;  %s27_s16 = int_to_ptr.hbm [resolvable:$true] %s26_s16 }
   0x4   :  { %20 = dma.hbm_to_vmem [thread:$0]  %s16_s11, 128, %s18_s13, [#allocation3]  }
   0x5   :  { %s146_s17 = smov [#allocation5]  }
   0x6   :  { %s28_s18 = sshll.u32 %s146_s17, 4  ;;  %s29_s18 = int_to_ptr.vmem [resolvable:$true] %s28_s18 }
   0x7   :  { %31 = dma.hbm_to_vmem [thread:$0]  %s27_s16, 128, %s29_s18, [#allocation6]  }
   0x8   :  { %139 = dma.done.wait [#allocation3], 128  }
   0x9   :  { %140 = vsyncadd [#allocation3], 4294967168 }
   0xa   :  { %141 = dma.done.wait [#allocation6], 128  }
   0xb   :  { %142 = vsyncadd [#allocation6], 4294967168  ;;  %v40_v0 = vld [vmem:[#allocation2] sm:$0xff]  ;;  %v41_v1 = vld [vmem:[#allocation5] sm:$0xff]  ;;  %s147_s0 = smov [#allocation7]   ;;  %s53_s22 = sshll.u32 %s174_s2, 4  ;;  %s54_s22 = int_to_ptr.hbm [resolvable:$true] %s53_s22 }
   0xc   :  { %s51_s19 = sshll.u32 %s147_s0, 4  ;;  %v42_v2 = vsub.f32 %v40_v0, %v41_v1  ;;  %s52_s19 = int_to_ptr.vmem [resolvable:$true] %s51_s19 }
   0xe   :  { %v43_v3 = vmul.f32 %v42_v2, %v42_v2 }
  0x10   :  { %45 = vst [vmem:[#allocation7] sm:$0xff] %v43_v3 }
  0x11   :  { %56 = dma.vmem_to_hbm [thread:$0]  %s52_s19, 128, %s54_s22, [#allocation4]  }
  0x12   :  { %143 = dma.done.wait [#allocation4], 128  }
  0x13   :  { %144 = vsyncadd [#allocation4], 4294967168 }
  0x14   :  { %61 = vsyncpa [#allocation3], 1 }
  0x15   :  { %62 = vsyncpa [#allocation6], 1 }
  0x16   :  { %63 = vsyncpa [#allocation4], 1 }

</bundles_post_ra>
